<compile_context>
chip_gen: v5e
topology: v5e:2x2
jax: 0.10.0
libtpu: 0.0.40
codegen_flags: <defaults>
</compile_context>

<pallas_src>
import math
import functools

import jax
import jax.numpy as jnp
from jax import lax
from jax.experimental import pallas as pl
from jax.experimental.pallas import tpu as pltpu


def _transformer_block_kernel(heads, k, seq_major,
                              x_ref, mask_ref, wqkv_ref, wc_ref,
                              w1_ref, b1_ref, w2_ref, pk_ref,
                              out_ref):
    hk = heads * k
    scale = 1.0 / math.sqrt(k)

    if seq_major:
        p, bn, d = x_ref.shape          # (seq, batch_block, d) -- collapsed-grid path
    else:
        bn, p, d = x_ref.shape          # (batch_block, seq, d) -- per-batch grid path

    mask = mask_ref[...]                # (p, p), additive attention mask
    wqkv = wqkv_ref[...]                # (d, 3*hk) fused [wq^T | wk^T | wv^T]
    wc = wc_ref[...]                    # (hk, d)
    w1 = w1_ref[...]                    # (d, m)
    b1 = b1_ref[...]                    # (1, m)
    w2 = w2_ref[...]                    # (m, d)
    pk = pk_ref[...]                    # (8, d): [b2, ln1_g, ln1_b, ln2_g, ln2_b, pad...]
    b2, g1, be1, g2, be2 = pk[0:1], pk[1:2], pk[2:3], pk[3:4], pk[4:5]

    for b in range(bn):                 # bn is static & tiny -> fully unrolled
        x = x_ref[:, b, :] if seq_major else x_ref[b]                      # (p, d)

        # Fused QKV projection: one MXU push with 3*hk output lanes.
        qkv = jnp.dot(x, wqkv, preferred_element_type=jnp.float32)         # (p, 3*hk)

        # Per-head attention; accumulate wc-projected head outputs so the
        # (p, hk) head tensor is never materialized / concatenated.
        acc = jnp.zeros((p, d), jnp.float32)
        for hi in range(heads):
            lo = hi * k
            qh = qkv[:, lo:lo + k]
            kh = qkv[:, hk + lo:hk + lo + k]
            vh = qkv[:, 2 * hk + lo:2 * hk + lo + k]
            # q @ k^T without an explicit transpose: contract last dims.
            s = lax.dot_general(qh, kh, (((1,), (1,)), ((), ())),
                                preferred_element_type=jnp.float32) * scale + mask
            s = s - jnp.max(s, axis=-1, keepdims=True)
            e = jnp.exp(s)
            prob = e * pl.reciprocal(jnp.sum(e, axis=-1, keepdims=True), approx=True)
            hv = jnp.dot(prob, vh, preferred_element_type=jnp.float32)     # (p, k)
            acc = acc + jnp.dot(hv, wc[lo:lo + k, :],
                                preferred_element_type=jnp.float32)        # (p, d)

        # residual + LayerNorm1
        u = acc + x
        mu = jnp.mean(u, axis=-1, keepdims=True)
        var = jnp.mean((u - mu) ** 2, axis=-1, keepdims=True)
        u = (u - mu) * lax.rsqrt(var + 1e-5) * g1 + be1

        # FFN + residual + LayerNorm2
        z = jnp.maximum(jnp.dot(u, w1, preferred_element_type=jnp.float32) + b1, 0.0)
        z = jnp.dot(z, w2, preferred_element_type=jnp.float32) + b2
        z = z + u
        mu2 = jnp.mean(z, axis=-1, keepdims=True)
        var2 = jnp.mean((z - mu2) ** 2, axis=-1, keepdims=True)
        y = (z - mu2) * lax.rsqrt(var2 + 1e-5) * g2 + be2

        if seq_major:
            out_ref[:, b, :] = y
        else:
            out_ref[b] = y


def _is_dual_core_chip():
    """True on chips with 2 TensorCores (v7x); False on single-TC v5e/v6e."""
    try:
        kind = jax.devices()[0].device_kind.lower()
    except Exception:
        return False
    return ("v7" in kind) or ("7x" in kind)


def transformer_block(x_sbd, mask, params, *, heads, k):
    """x_sbd: (seq, batch, d) float32; mask: (seq, seq) float32 (added to logits)."""
    p, n, d = x_sbd.shape
    hk = heads * k
    m = params["w1"].shape[1]

    # Wrapper-side (one-time / traced) packing: fused QKV weight and packed small vectors.
    wqkv = jnp.concatenate([params["wq"], params["wk"], params["wv"]], axis=1)   # (d, 3hk)
    pk = jnp.concatenate(
        [params["b2"], params["ln1_g"], params["ln1_b"],
         params["ln2_g"], params["ln2_b"], jnp.zeros((3, d), jnp.float32)],
        axis=0)                                                                  # (8, d)

    def const(shape):
        return pl.BlockSpec(shape, lambda b: (0,) * len(shape))

    common_in_specs = [
        const((p, p)),        # additive mask
        const((d, 3 * hk)),   # fused qkv weight
        const((hk, d)),       # wc^T
        const((d, m)),        # w1^T
        const((1, m)),        # b1
        const((m, d)),        # w2^T
        const((8, d)),        # packed [b2, ln1_g, ln1_b, ln2_g, ln2_b, pad]
    ]
    const_args = (mask, wqkv, params["wc"], params["w1"], params["b1"], params["w2"], pk)

    if _is_dual_core_chip() and n > 1:
        # v7x: keep batch as a parallel grid axis so both TensorCores get work.
        x_bsd = jnp.transpose(x_sbd, (1, 0, 2))                 # (n, p, d)
        kernel = functools.partial(_transformer_block_kernel, heads, k, False)
        out = pl.pallas_call(
            kernel,
            out_shape=jax.ShapeDtypeStruct((n, p, d), jnp.float32),
            grid_spec=pltpu.PrefetchScalarGridSpec(
                num_scalar_prefetch=0,
                grid=(n,),
                in_specs=[pl.BlockSpec((1, p, d), lambda b: (b, 0, 0))] + common_in_specs,
                out_specs=pl.BlockSpec((1, p, d), lambda b: (b, 0, 0)),
            ),
            compiler_params=pltpu.CompilerParams(dimension_semantics=("parallel",)),
        )(x_bsd, *const_args)
        return jnp.transpose(out, (1, 0, 2))                    # back to (seq, batch, d)

    # v5e / v6e (single TensorCore): one grid step over the full (seq, batch, d)
    # array, batch handled inside the kernel; no wrapper transposes, no per-step
    # pipeline overhead, no repeated constant-block setup.
    kernel = functools.partial(_transformer_block_kernel, heads, k, True)
    return pl.pallas_call(
        kernel,
        out_shape=jax.ShapeDtypeStruct((p, n, d), jnp.float32),
        grid_spec=pltpu.PrefetchScalarGridSpec(
            num_scalar_prefetch=0,
            grid=(1,),
            in_specs=[pl.BlockSpec((p, n, d), lambda b: (0, 0, 0))] + common_in_specs,
            out_specs=pl.BlockSpec((p, n, d), lambda b: (0, 0, 0)),
        ),
        compiler_params=pltpu.CompilerParams(dimension_semantics=("arbitrary",)),
    )(x_sbd, *const_args)


def _reference(x_sbd, mask, params, *, heads, k):
    """Pure-JAX reference mirroring the PyTorch forward (dropout = 0)."""
    p, n, d = x_sbd.shape
    x_ = jnp.transpose(x_sbd, (1, 0, 2))                        # (n, p, d)
    Q = (x_ @ params["wq"]).reshape(n, p, heads, k).transpose(0, 2, 1, 3)
    K = (x_ @ params["wk"]).reshape(n, p, heads, k).transpose(0, 2, 3, 1)
    V = (x_ @ params["wv"]).reshape(n, p, heads, k).transpose(0, 2, 1, 3)
    dot = (Q @ K) / math.sqrt(k) + mask
    A = jax.nn.softmax(dot, axis=3)
    u = (A @ V).transpose(0, 2, 1, 3).reshape(n, p, heads * k)
    u = u @ params["wc"]
    u = u + x_
    mu = u.mean(-1, keepdims=True)
    var = ((u - mu) ** 2).mean(-1, keepdims=True)
    u = (u - mu) * jax.lax.rsqrt(var + 1e-5) * params["ln1_g"] + params["ln1_b"]
    z = jnp.maximum(u @ params["w1"] + params["b1"], 0.0) @ params["w2"] + params["b2"]
    z = z + u
    mu2 = z.mean(-1, keepdims=True)
    var2 = ((z - mu2) ** 2).mean(-1, keepdims=True)
    out = (z - mu2) * jax.lax.rsqrt(var2 + 1e-5) * params["ln2_g"] + params["ln2_b"]
    return jnp.transpose(out, (1, 0, 2))


if __name__ == "__main__":
    # small shapes consistent with the module's forward: x is (seq_len, batch, d)
    seq, batch, d = 8, 2, 32
    heads, k, m = 2, 16, 64
    hk = heads * k

    key = jax.random.PRNGKey(0)
    keys = jax.random.split(key, 9)

    # PyTorch-style init: N(0, 0.02) weights, zero biases, LayerNorm gamma=1 / beta=0.
    # Linear weights stored pre-transposed as (in_features, out_features).
    params = {
        "wq": 0.02 * jax.random.normal(keys[0], (d, hk), jnp.float32),
        "wk": 0.02 * jax.random.normal(keys[1], (d, hk), jnp.float32),
        "wv": 0.02 * jax.random.normal(keys[2], (d, hk), jnp.float32),
        "wc": 0.02 * jax.random.normal(keys[3], (hk, d), jnp.float32),
        "w1": 0.02 * jax.random.normal(keys[4], (d, m), jnp.float32),
        "b1": jnp.zeros((1, m), jnp.float32),
        "w2": 0.02 * jax.random.normal(keys[5], (m, d), jnp.float32),
        "b2": jnp.zeros((1, d), jnp.float32),
        "ln1_g": jnp.ones((1, d), jnp.float32),
        "ln1_b": jnp.zeros((1, d), jnp.float32),
        "ln2_g": jnp.ones((1, d), jnp.float32),
        "ln2_b": jnp.zeros((1, d), jnp.float32),
    }

    x = jax.random.normal(keys[6], (seq, batch, d), jnp.float32)
    # additive causal mask (0 on/below diagonal, -1e9 above)
    mask = jnp.where(
        jnp.tril(jnp.ones((seq, seq), bool)), 0.0, -1e9
    ).astype(jnp.float32)

    out = transformer_block(x, mask, params, heads=heads, k=k)
    out = jax.block_until_ready(out)

    ref = _reference(x, mask, params, heads=heads, k=k)
    assert out.shape == (seq, batch, d)
    # tolerance loosened slightly vs 1e-4 because the softmax denominator uses the
    # approximate EUP reciprocal (pl.reciprocal(approx=True)); output is O(1) post-LN.
    assert jnp.allclose(out, ref, atol=2e-3, rtol=2e-3), "mismatch vs reference"

    print("KERNEL_OK")
</pallas_src>

<mosaic_0001>
module attributes {stable_mosaic.version = 11 : i64} {
  func.func @_transformer_block_kernel(%arg0: i32, %arg1: memref<8x2x32xf32, #tpu.memory_space<vmem>>, %arg2: memref<8x8xf32, #tpu.memory_space<vmem>>, %arg3: memref<32x96xf32, #tpu.memory_space<vmem>>, %arg4: memref<32x32xf32, #tpu.memory_space<vmem>>, %arg5: memref<32x64xf32, #tpu.memory_space<vmem>>, %arg6: memref<1x64xf32, #tpu.memory_space<vmem>>, %arg7: memref<64x32xf32, #tpu.memory_space<vmem>>, %arg8: memref<8x32xf32, #tpu.memory_space<vmem>>, %arg9: memref<8x2x32xf32, #tpu.memory_space<vmem>>) attributes {dimension_semantics = [#tpu.dimension_semantics<arbitrary>], iteration_bounds = array<i64: 1>, scalar_prefetch = 0 : i64, scratch_operands = 0 : i64, tpu.core_type = #tpu.core_type<tc>, window_params = [{pipeline_mode = #tpu.pipeline_mode<synchronous>, transform_indices = @transform_0, window_bounds = array<i64: 8, 2, 32>}, {pipeline_mode = #tpu.pipeline_mode<synchronous>, transform_indices = @transform_1, window_bounds = array<i64: 8, 8>}, {pipeline_mode = #tpu.pipeline_mode<synchronous>, transform_indices = @transform_2, window_bounds = array<i64: 32, 96>}, {pipeline_mode = #tpu.pipeline_mode<synchronous>, transform_indices = @transform_3, window_bounds = array<i64: 32, 32>}, {pipeline_mode = #tpu.pipeline_mode<synchronous>, transform_indices = @transform_4, window_bounds = array<i64: 32, 64>}, {pipeline_mode = #tpu.pipeline_mode<synchronous>, transform_indices = @transform_5, window_bounds = array<i64: 1, 64>}, {pipeline_mode = #tpu.pipeline_mode<synchronous>, transform_indices = @transform_6, window_bounds = array<i64: 64, 32>}, {pipeline_mode = #tpu.pipeline_mode<synchronous>, transform_indices = @transform_7, window_bounds = array<i64: 8, 32>}, {pipeline_mode = #tpu.pipeline_mode<synchronous>, transform_indices = @transform_8, window_bounds = array<i64: 8, 2, 32>}]} {
    %c0 = arith.constant 0 : index
    %c0_0 = arith.constant 0 : index
    %0 = vector.load %arg2[%c0, %c0_0] : memref<8x8xf32, #tpu.memory_space<vmem>>, vector<8x8xf32>
    %c0_1 = arith.constant 0 : index
    %c0_2 = arith.constant 0 : index
    %1 = vector.load %arg3[%c0_1, %c0_2] : memref<32x96xf32, #tpu.memory_space<vmem>>, vector<32x96xf32>
    %c0_3 = arith.constant 0 : index
    %c0_4 = arith.constant 0 : index
    %2 = vector.load %arg4[%c0_3, %c0_4] : memref<32x32xf32, #tpu.memory_space<vmem>>, vector<32x32xf32>
    %c0_5 = arith.constant 0 : index
    %c0_6 = arith.constant 0 : index
    %3 = vector.load %arg5[%c0_5, %c0_6] : memref<32x64xf32, #tpu.memory_space<vmem>>, vector<32x64xf32>
    %c0_7 = arith.constant 0 : index
    %c0_8 = arith.constant 0 : index
    %4 = vector.load %arg6[%c0_7, %c0_8] : memref<1x64xf32, #tpu.memory_space<vmem>>, vector<1x64xf32>
    %c0_9 = arith.constant 0 : index
    %c0_10 = arith.constant 0 : index
    %5 = vector.load %arg7[%c0_9, %c0_10] : memref<64x32xf32, #tpu.memory_space<vmem>>, vector<64x32xf32>
    %c0_11 = arith.constant 0 : index
    %c0_12 = arith.constant 0 : index
    %6 = vector.load %arg8[%c0_11, %c0_12] : memref<8x32xf32, #tpu.memory_space<vmem>>, vector<8x32xf32>
    %7 = vector.extract_strided_slice %6 {offsets = [0, 0], sizes = [1, 32], strides = [1, 1]} : vector<8x32xf32> to vector<1x32xf32>
    %8 = vector.extract_strided_slice %6 {offsets = [1, 0], sizes = [1, 32], strides = [1, 1]} : vector<8x32xf32> to vector<1x32xf32>
    %9 = vector.extract_strided_slice %6 {offsets = [2, 0], sizes = [1, 32], strides = [1, 1]} : vector<8x32xf32> to vector<1x32xf32>
    %10 = vector.extract_strided_slice %6 {offsets = [3, 0], sizes = [1, 32], strides = [1, 1]} : vector<8x32xf32> to vector<1x32xf32>
    %11 = vector.extract_strided_slice %6 {offsets = [4, 0], sizes = [1, 32], strides = [1, 1]} : vector<8x32xf32> to vector<1x32xf32>
    %c0_13 = arith.constant 0 : index
    %c0_14 = arith.constant 0 : index
    %c0_15 = arith.constant 0 : index
    %12 = vector.load %arg1[%c0_13, %c0_14, %c0_15] : memref<8x2x32xf32, #tpu.memory_space<vmem>>, vector<8x1x32xf32>
    %13 = vector.shape_cast %12 : vector<8x1x32xf32> to vector<8x32xf32>
    %cst = arith.constant dense<0.000000e+00> : vector<8x96xf32>
    %14 = tpu.matmul %13, %1, %cst {dimension_numbers = #tpu.dot_dimension_numbers<[1], [0], [0], [1], [0, 0, 1, 1], [], []>} : vector<8x32xf32>, vector<32x96xf32>, vector<8x96xf32> -> vector<8x96xf32>
    %cst_16 = arith.constant 0.000000e+00 : f32
    %15 = vector.broadcast %cst_16 : f32 to vector<8x32xf32>
    %16 = vector.extract_strided_slice %14 {offsets = [0, 0], sizes = [8, 16], strides = [1, 1]} : vector<8x96xf32> to vector<8x16xf32>
    %17 = vector.extract_strided_slice %14 {offsets = [0, 32], sizes = [8, 16], strides = [1, 1]} : vector<8x96xf32> to vector<8x16xf32>
    %18 = vector.extract_strided_slice %14 {offsets = [0, 64], sizes = [8, 16], strides = [1, 1]} : vector<8x96xf32> to vector<8x16xf32>
    %cst_17 = arith.constant dense<0.000000e+00> : vector<8x8xf32>
    %19 = tpu.matmul %16, %17, %cst_17 {dimension_numbers = #tpu.dot_dimension_numbers<[1], [1], [0], [0], [0, 0, 1, 0], [], []>} : vector<8x16xf32>, vector<8x16xf32>, vector<8x8xf32> -> vector<8x8xf32>
    %cst_18 = arith.constant 2.500000e-01 : f32
    %20 = vector.broadcast %cst_18 : f32 to vector<8x8xf32>
    %21 = arith.mulf %19, %20 : vector<8x8xf32>
    %22 = arith.addf %21, %0 : vector<8x8xf32>
    %cst_19 = arith.constant dense<0xFF800000> : vector<8xf32>
    %23 = vector.multi_reduction <maximumf>, %22, %cst_19 [1] : vector<8x8xf32> to vector<8xf32>
    %24 = vector.shape_cast %23 : vector<8xf32> to vector<8x1xf32>
    %25 = vector.broadcast %24 : vector<8x1xf32> to vector<8x8xf32>
    %26 = arith.subf %22, %25 : vector<8x8xf32>
    %27 = math.exp %26 : vector<8x8xf32>
    %cst_20 = arith.constant dense<0.000000e+00> : vector<8xf32>
    %28 = vector.multi_reduction <add>, %27, %cst_20 [1] : vector<8x8xf32> to vector<8xf32>
    %29 = vector.shape_cast %28 : vector<8xf32> to vector<8x1xf32>
    %30 = tpu.reciprocal %29 {approx = true} : vector<8x1xf32> -> vector<8x1xf32>
    %31 = vector.broadcast %30 : vector<8x1xf32> to vector<8x8xf32>
    %32 = arith.mulf %27, %31 : vector<8x8xf32>
    %cst_21 = arith.constant dense<0.000000e+00> : vector<8x16xf32>
    %33 = tpu.matmul %32, %18, %cst_21 {dimension_numbers = #tpu.dot_dimension_numbers<[1], [0], [0], [1], [0, 0, 1, 1], [], []>} : vector<8x8xf32>, vector<8x16xf32>, vector<8x16xf32> -> vector<8x16xf32>
    %34 = vector.extract_strided_slice %2 {offsets = [0, 0], sizes = [16, 32], strides = [1, 1]} : vector<32x32xf32> to vector<16x32xf32>
    %cst_22 = arith.constant dense<0.000000e+00> : vector<8x32xf32>
    %35 = tpu.matmul %33, %34, %cst_22 {dimension_numbers = #tpu.dot_dimension_numbers<[1], [0], [0], [1], [0, 0, 1, 1], [], []>} : vector<8x16xf32>, vector<16x32xf32>, vector<8x32xf32> -> vector<8x32xf32>
    %36 = arith.addf %15, %35 : vector<8x32xf32>
    %37 = vector.extract_strided_slice %14 {offsets = [0, 16], sizes = [8, 16], strides = [1, 1]} : vector<8x96xf32> to vector<8x16xf32>
    %38 = vector.extract_strided_slice %14 {offsets = [0, 48], sizes = [8, 16], strides = [1, 1]} : vector<8x96xf32> to vector<8x16xf32>
    %39 = vector.extract_strided_slice %14 {offsets = [0, 80], sizes = [8, 16], strides = [1, 1]} : vector<8x96xf32> to vector<8x16xf32>
    %cst_23 = arith.constant dense<0.000000e+00> : vector<8x8xf32>
    %40 = tpu.matmul %37, %38, %cst_23 {dimension_numbers = #tpu.dot_dimension_numbers<[1], [1], [0], [0], [0, 0, 1, 0], [], []>} : vector<8x16xf32>, vector<8x16xf32>, vector<8x8xf32> -> vector<8x8xf32>
    %cst_24 = arith.constant 2.500000e-01 : f32
    %41 = vector.broadcast %cst_24 : f32 to vector<8x8xf32>
    %42 = arith.mulf %40, %41 : vector<8x8xf32>
    %43 = arith.addf %42, %0 : vector<8x8xf32>
    %cst_25 = arith.constant dense<0xFF800000> : vector<8xf32>
    %44 = vector.multi_reduction <maximumf>, %43, %cst_25 [1] : vector<8x8xf32> to vector<8xf32>
    %45 = vector.shape_cast %44 : vector<8xf32> to vector<8x1xf32>
    %46 = vector.broadcast %45 : vector<8x1xf32> to vector<8x8xf32>
    %47 = arith.subf %43, %46 : vector<8x8xf32>
    %48 = math.exp %47 : vector<8x8xf32>
    %cst_26 = arith.constant dense<0.000000e+00> : vector<8xf32>
    %49 = vector.multi_reduction <add>, %48, %cst_26 [1] : vector<8x8xf32> to vector<8xf32>
    %50 = vector.shape_cast %49 : vector<8xf32> to vector<8x1xf32>
    %51 = tpu.reciprocal %50 {approx = true} : vector<8x1xf32> -> vector<8x1xf32>
    %52 = vector.broadcast %51 : vector<8x1xf32> to vector<8x8xf32>
    %53 = arith.mulf %48, %52 : vector<8x8xf32>
    %cst_27 = arith.constant dense<0.000000e+00> : vector<8x16xf32>
    %54 = tpu.matmul %53, %39, %cst_27 {dimension_numbers = #tpu.dot_dimension_numbers<[1], [0], [0], [1], [0, 0, 1, 1], [], []>} : vector<8x8xf32>, vector<8x16xf32>, vector<8x16xf32> -> vector<8x16xf32>
    %55 = vector.extract_strided_slice %2 {offsets = [16, 0], sizes = [16, 32], strides = [1, 1]} : vector<32x32xf32> to vector<16x32xf32>
    %cst_28 = arith.constant dense<0.000000e+00> : vector<8x32xf32>
    %56 = tpu.matmul %54, %55, %cst_28 {dimension_numbers = #tpu.dot_dimension_numbers<[1], [0], [0], [1], [0, 0, 1, 1], [], []>} : vector<8x16xf32>, vector<16x32xf32>, vector<8x32xf32> -> vector<8x32xf32>
    %57 = arith.addf %36, %56 : vector<8x32xf32>
    %58 = arith.addf %57, %13 : vector<8x32xf32>
    %cst_29 = arith.constant dense<0.000000e+00> : vector<8xf32>
    %59 = vector.multi_reduction <add>, %58, %cst_29 [1] : vector<8x32xf32> to vector<8xf32>
    %60 = vector.shape_cast %59 : vector<8xf32> to vector<8x1xf32>
    %cst_30 = arith.constant 3.200000e+01 : f32
    %61 = vector.broadcast %cst_30 : f32 to vector<8x1xf32>
    %62 = arith.divf %60, %61 : vector<8x1xf32>
    %63 = vector.broadcast %62 : vector<8x1xf32> to vector<8x32xf32>
    %64 = arith.subf %58, %63 : vector<8x32xf32>
    %65 = arith.mulf %64, %64 : vector<8x32xf32>
    %cst_31 = arith.constant dense<0.000000e+00> : vector<8xf32>
    %66 = vector.multi_reduction <add>, %65, %cst_31 [1] : vector<8x32xf32> to vector<8xf32>
    %67 = vector.shape_cast %66 : vector<8xf32> to vector<8x1xf32>
    %cst_32 = arith.constant 3.200000e+01 : f32
    %68 = vector.broadcast %cst_32 : f32 to vector<8x1xf32>
    %69 = arith.divf %67, %68 : vector<8x1xf32>
    %70 = vector.broadcast %62 : vector<8x1xf32> to vector<8x32xf32>
    %71 = arith.subf %58, %70 : vector<8x32xf32>
    %cst_33 = arith.constant 9.99999974E-6 : f32
    %72 = vector.broadcast %cst_33 : f32 to vector<8x1xf32>
    %73 = arith.addf %69, %72 : vector<8x1xf32>
    %74 = math.rsqrt %73 : vector<8x1xf32>
    %75 = vector.broadcast %74 : vector<8x1xf32> to vector<8x32xf32>
    %76 = arith.mulf %71, %75 : vector<8x32xf32>
    %77 = vector.broadcast %8 : vector<1x32xf32> to vector<8x32xf32>
    %78 = arith.mulf %76, %77 : vector<8x32xf32>
    %79 = vector.broadcast %9 : vector<1x32xf32> to vector<8x32xf32>
    %80 = arith.addf %78, %79 : vector<8x32xf32>
    %cst_34 = arith.constant dense<0.000000e+00> : vector<8x64xf32>
    %81 = tpu.matmul %80, %3, %cst_34 {dimension_numbers = #tpu.dot_dimension_numbers<[1], [0], [0], [1], [0, 0, 1, 1], [], []>} : vector<8x32xf32>, vector<32x64xf32>, vector<8x64xf32> -> vector<8x64xf32>
    %82 = vector.broadcast %4 : vector<1x64xf32> to vector<8x64xf32>
    %83 = arith.addf %81, %82 : vector<8x64xf32>
    %cst_35 = arith.constant 0.000000e+00 : f32
    %84 = vector.broadcast %cst_35 : f32 to vector<8x64xf32>
    %85 = arith.maximumf %83, %84 : vector<8x64xf32>
    %cst_36 = arith.constant dense<0.000000e+00> : vector<8x32xf32>
    %86 = tpu.matmul %85, %5, %cst_36 {dimension_numbers = #tpu.dot_dimension_numbers<[1], [0], [0], [1], [0, 0, 1, 1], [], []>} : vector<8x64xf32>, vector<64x32xf32>, vector<8x32xf32> -> vector<8x32xf32>
    %87 = vector.broadcast %7 : vector<1x32xf32> to vector<8x32xf32>
    %88 = arith.addf %86, %87 : vector<8x32xf32>
    %89 = arith.addf %88, %80 : vector<8x32xf32>
    %cst_37 = arith.constant dense<0.000000e+00> : vector<8xf32>
    %90 = vector.multi_reduction <add>, %89, %cst_37 [1] : vector<8x32xf32> to vector<8xf32>
    %91 = vector.shape_cast %90 : vector<8xf32> to vector<8x1xf32>
    %cst_38 = arith.constant 3.200000e+01 : f32
    %92 = vector.broadcast %cst_38 : f32 to vector<8x1xf32>
    %93 = arith.divf %91, %92 : vector<8x1xf32>
    %94 = vector.broadcast %93 : vector<8x1xf32> to vector<8x32xf32>
    %95 = arith.subf %89, %94 : vector<8x32xf32>
    %96 = arith.mulf %95, %95 : vector<8x32xf32>
    %cst_39 = arith.constant dense<0.000000e+00> : vector<8xf32>
    %97 = vector.multi_reduction <add>, %96, %cst_39 [1] : vector<8x32xf32> to vector<8xf32>
    %98 = vector.shape_cast %97 : vector<8xf32> to vector<8x1xf32>
    %cst_40 = arith.constant 3.200000e+01 : f32
    %99 = vector.broadcast %cst_40 : f32 to vector<8x1xf32>
    %100 = arith.divf %98, %99 : vector<8x1xf32>
    %101 = vector.broadcast %93 : vector<8x1xf32> to vector<8x32xf32>
    %102 = arith.subf %89, %101 : vector<8x32xf32>
    %cst_41 = arith.constant 9.99999974E-6 : f32
    %103 = vector.broadcast %cst_41 : f32 to vector<8x1xf32>
    %104 = arith.addf %100, %103 : vector<8x1xf32>
    %105 = math.rsqrt %104 : vector<8x1xf32>
    %106 = vector.broadcast %105 : vector<8x1xf32> to vector<8x32xf32>
    %107 = arith.mulf %102, %106 : vector<8x32xf32>
    %108 = vector.broadcast %10 : vector<1x32xf32> to vector<8x32xf32>
    %109 = arith.mulf %107, %108 : vector<8x32xf32>
    %110 = vector.broadcast %11 : vector<1x32xf32> to vector<8x32xf32>
    %111 = arith.addf %109, %110 : vector<8x32xf32>
    %c0_42 = arith.constant 0 : index
    %c0_43 = arith.constant 0 : index
    %c0_44 = arith.constant 0 : index
    %112 = vector.load %arg9[%c0_42, %c0_43, %c0_44] : memref<8x2x32xf32, #tpu.memory_space<vmem>>, vector<8x1x32xf32>
    %113 = vector.shape_cast %112 : vector<8x1x32xf32> to vector<8x32xf32>
    %114 = vector.shape_cast %111 : vector<8x32xf32> to vector<8x1x32xf32>
    tpu.vector_store %arg9[%c0_42, %c0_43, %c0_44], %114 {strides = array<i32>} : memref<8x2x32xf32, #tpu.memory_space<vmem>>, vector<8x1x32xf32>,
    %c0_45 = arith.constant 0 : index
    %c1 = arith.constant 1 : index
    %c0_46 = arith.constant 0 : index
    %115 = vector.load %arg1[%c0_45, %c1, %c0_46] : memref<8x2x32xf32, #tpu.memory_space<vmem>>, vector<8x1x32xf32>
    %116 = vector.shape_cast %115 : vector<8x1x32xf32> to vector<8x32xf32>
    %cst_47 = arith.constant dense<0.000000e+00> : vector<8x96xf32>
    %117 = tpu.matmul %116, %1, %cst_47 {dimension_numbers = #tpu.dot_dimension_numbers<[1], [0], [0], [1], [0, 0, 1, 1], [], []>} : vector<8x32xf32>, vector<32x96xf32>, vector<8x96xf32> -> vector<8x96xf32>
    %cst_48 = arith.constant 0.000000e+00 : f32
    %118 = vector.broadcast %cst_48 : f32 to vector<8x32xf32>
    %119 = vector.extract_strided_slice %117 {offsets = [0, 0], sizes = [8, 16], strides = [1, 1]} : vector<8x96xf32> to vector<8x16xf32>
    %120 = vector.extract_strided_slice %117 {offsets = [0, 32], sizes = [8, 16], strides = [1, 1]} : vector<8x96xf32> to vector<8x16xf32>
    %121 = vector.extract_strided_slice %117 {offsets = [0, 64], sizes = [8, 16], strides = [1, 1]} : vector<8x96xf32> to vector<8x16xf32>
    %cst_49 = arith.constant dense<0.000000e+00> : vector<8x8xf32>
    %122 = tpu.matmul %119, %120, %cst_49 {dimension_numbers = #tpu.dot_dimension_numbers<[1], [1], [0], [0], [0, 0, 1, 0], [], []>} : vector<8x16xf32>, vector<8x16xf32>, vector<8x8xf32> -> vector<8x8xf32>
    %cst_50 = arith.constant 2.500000e-01 : f32
    %123 = vector.broadcast %cst_50 : f32 to vector<8x8xf32>
    %124 = arith.mulf %122, %123 : vector<8x8xf32>
    %125 = arith.addf %124, %0 : vector<8x8xf32>
    %cst_51 = arith.constant dense<0xFF800000> : vector<8xf32>
    %126 = vector.multi_reduction <maximumf>, %125, %cst_51 [1] : vector<8x8xf32> to vector<8xf32>
    %127 = vector.shape_cast %126 : vector<8xf32> to vector<8x1xf32>
    %128 = vector.broadcast %127 : vector<8x1xf32> to vector<8x8xf32>
    %129 = arith.subf %125, %128 : vector<8x8xf32>
    %130 = math.exp %129 : vector<8x8xf32>
    %cst_52 = arith.constant dense<0.000000e+00> : vector<8xf32>
    %131 = vector.multi_reduction <add>, %130, %cst_52 [1] : vector<8x8xf32> to vector<8xf32>
    %132 = vector.shape_cast %131 : vector<8xf32> to vector<8x1xf32>
    %133 = tpu.reciprocal %132 {approx = true} : vector<8x1xf32> -> vector<8x1xf32>
    %134 = vector.broadcast %133 : vector<8x1xf32> to vector<8x8xf32>
    %135 = arith.mulf %130, %134 : vector<8x8xf32>
    %cst_53 = arith.constant dense<0.000000e+00> : vector<8x16xf32>
    %136 = tpu.matmul %135, %121, %cst_53 {dimension_numbers = #tpu.dot_dimension_numbers<[1], [0], [0], [1], [0, 0, 1, 1], [], []>} : vector<8x8xf32>, vector<8x16xf32>, vector<8x16xf32> -> vector<8x16xf32>
    %137 = vector.extract_strided_slice %2 {offsets = [0, 0], sizes = [16, 32], strides = [1, 1]} : vector<32x32xf32> to vector<16x32xf32>
    %cst_54 = arith.constant dense<0.000000e+00> : vector<8x32xf32>
    %138 = tpu.matmul %136, %137, %cst_54 {dimension_numbers = #tpu.dot_dimension_numbers<[1], [0], [0], [1], [0, 0, 1, 1], [], []>} : vector<8x16xf32>, vector<16x32xf32>, vector<8x32xf32> -> vector<8x32xf32>
    %139 = arith.addf %118, %138 : vector<8x32xf32>
    %140 = vector.extract_strided_slice %117 {offsets = [0, 16], sizes = [8, 16], strides = [1, 1]} : vector<8x96xf32> to vector<8x16xf32>
    %141 = vector.extract_strided_slice %117 {offsets = [0, 48], sizes = [8, 16], strides = [1, 1]} : vector<8x96xf32> to vector<8x16xf32>
    %142 = vector.extract_strided_slice %117 {offsets = [0, 80], sizes = [8, 16], strides = [1, 1]} : vector<8x96xf32> to vector<8x16xf32>
    %cst_55 = arith.constant dense<0.000000e+00> : vector<8x8xf32>
    %143 = tpu.matmul %140, %141, %cst_55 {dimension_numbers = #tpu.dot_dimension_numbers<[1], [1], [0], [0], [0, 0, 1, 0], [], []>} : vector<8x16xf32>, vector<8x16xf32>, vector<8x8xf32> -> vector<8x8xf32>
    %cst_56 = arith.constant 2.500000e-01 : f32
    %144 = vector.broadcast %cst_56 : f32 to vector<8x8xf32>
    %145 = arith.mulf %143, %144 : vector<8x8xf32>
    %146 = arith.addf %145, %0 : vector<8x8xf32>
    %cst_57 = arith.constant dense<0xFF800000> : vector<8xf32>
    %147 = vector.multi_reduction <maximumf>, %146, %cst_57 [1] : vector<8x8xf32> to vector<8xf32>
    %148 = vector.shape_cast %147 : vector<8xf32> to vector<8x1xf32>
    %149 = vector.broadcast %148 : vector<8x1xf32> to vector<8x8xf32>
    %150 = arith.subf %146, %149 : vector<8x8xf32>
    %151 = math.exp %150 : vector<8x8xf32>
    %cst_58 = arith.constant dense<0.000000e+00> : vector<8xf32>
    %152 = vector.multi_reduction <add>, %151, %cst_58 [1] : vector<8x8xf32> to vector<8xf32>
    %153 = vector.shape_cast %152 : vector<8xf32> to vector<8x1xf32>
    %154 = tpu.reciprocal %153 {approx = true} : vector<8x1xf32> -> vector<8x1xf32>
    %155 = vector.broadcast %154 : vector<8x1xf32> to vector<8x8xf32>
    %156 = arith.mulf %151, %155 : vector<8x8xf32>
    %cst_59 = arith.constant dense<0.000000e+00> : vector<8x16xf32>
    %157 = tpu.matmul %156, %142, %cst_59 {dimension_numbers = #tpu.dot_dimension_numbers<[1], [0], [0], [1], [0, 0, 1, 1], [], []>} : vector<8x8xf32>, vector<8x16xf32>, vector<8x16xf32> -> vector<8x16xf32>
    %158 = vector.extract_strided_slice %2 {offsets = [16, 0], sizes = [16, 32], strides = [1, 1]} : vector<32x32xf32> to vector<16x32xf32>
    %cst_60 = arith.constant dense<0.000000e+00> : vector<8x32xf32>
    %159 = tpu.matmul %157, %158, %cst_60 {dimension_numbers = #tpu.dot_dimension_numbers<[1], [0], [0], [1], [0, 0, 1, 1], [], []>} : vector<8x16xf32>, vector<16x32xf32>, vector<8x32xf32> -> vector<8x32xf32>
    %160 = arith.addf %139, %159 : vector<8x32xf32>
    %161 = arith.addf %160, %116 : vector<8x32xf32>
    %cst_61 = arith.constant dense<0.000000e+00> : vector<8xf32>
    %162 = vector.multi_reduction <add>, %161, %cst_61 [1] : vector<8x32xf32> to vector<8xf32>
    %163 = vector.shape_cast %162 : vector<8xf32> to vector<8x1xf32>
    %cst_62 = arith.constant 3.200000e+01 : f32
    %164 = vector.broadcast %cst_62 : f32 to vector<8x1xf32>
    %165 = arith.divf %163, %164 : vector<8x1xf32>
    %166 = vector.broadcast %165 : vector<8x1xf32> to vector<8x32xf32>
    %167 = arith.subf %161, %166 : vector<8x32xf32>
    %168 = arith.mulf %167, %167 : vector<8x32xf32>
    %cst_63 = arith.constant dense<0.000000e+00> : vector<8xf32>
    %169 = vector.multi_reduction <add>, %168, %cst_63 [1] : vector<8x32xf32> to vector<8xf32>
    %170 = vector.shape_cast %169 : vector<8xf32> to vector<8x1xf32>
    %cst_64 = arith.constant 3.200000e+01 : f32
    %171 = vector.broadcast %cst_64 : f32 to vector<8x1xf32>
    %172 = arith.divf %170, %171 : vector<8x1xf32>
    %173 = vector.broadcast %165 : vector<8x1xf32> to vector<8x32xf32>
    %174 = arith.subf %161, %173 : vector<8x32xf32>
    %cst_65 = arith.constant 9.99999974E-6 : f32
    %175 = vector.broadcast %cst_65 : f32 to vector<8x1xf32>
    %176 = arith.addf %172, %175 : vector<8x1xf32>
    %177 = math.rsqrt %176 : vector<8x1xf32>
    %178 = vector.broadcast %177 : vector<8x1xf32> to vector<8x32xf32>
    %179 = arith.mulf %174, %178 : vector<8x32xf32>
    %180 = vector.broadcast %8 : vector<1x32xf32> to vector<8x32xf32>
    %181 = arith.mulf %179, %180 : vector<8x32xf32>
    %182 = vector.broadcast %9 : vector<1x32xf32> to vector<8x32xf32>
    %183 = arith.addf %181, %182 : vector<8x32xf32>
    %cst_66 = arith.constant dense<0.000000e+00> : vector<8x64xf32>
    %184 = tpu.matmul %183, %3, %cst_66 {dimension_numbers = #tpu.dot_dimension_numbers<[1], [0], [0], [1], [0, 0, 1, 1], [], []>} : vector<8x32xf32>, vector<32x64xf32>, vector<8x64xf32> -> vector<8x64xf32>
    %185 = vector.broadcast %4 : vector<1x64xf32> to vector<8x64xf32>
    %186 = arith.addf %184, %185 : vector<8x64xf32>
    %cst_67 = arith.constant 0.000000e+00 : f32
    %187 = vector.broadcast %cst_67 : f32 to vector<8x64xf32>
    %188 = arith.maximumf %186, %187 : vector<8x64xf32>
    %cst_68 = arith.constant dense<0.000000e+00> : vector<8x32xf32>
    %189 = tpu.matmul %188, %5, %cst_68 {dimension_numbers = #tpu.dot_dimension_numbers<[1], [0], [0], [1], [0, 0, 1, 1], [], []>} : vector<8x64xf32>, vector<64x32xf32>, vector<8x32xf32> -> vector<8x32xf32>
    %190 = vector.broadcast %7 : vector<1x32xf32> to vector<8x32xf32>
    %191 = arith.addf %189, %190 : vector<8x32xf32>
    %192 = arith.addf %191, %183 : vector<8x32xf32>
    %cst_69 = arith.constant dense<0.000000e+00> : vector<8xf32>
    %193 = vector.multi_reduction <add>, %192, %cst_69 [1] : vector<8x32xf32> to vector<8xf32>
    %194 = vector.shape_cast %193 : vector<8xf32> to vector<8x1xf32>
    %cst_70 = arith.constant 3.200000e+01 : f32
    %195 = vector.broadcast %cst_70 : f32 to vector<8x1xf32>
    %196 = arith.divf %194, %195 : vector<8x1xf32>
    %197 = vector.broadcast %196 : vector<8x1xf32> to vector<8x32xf32>
    %198 = arith.subf %192, %197 : vector<8x32xf32>
    %199 = arith.mulf %198, %198 : vector<8x32xf32>
    %cst_71 = arith.constant dense<0.000000e+00> : vector<8xf32>
    %200 = vector.multi_reduction <add>, %199, %cst_71 [1] : vector<8x32xf32> to vector<8xf32>
    %201 = vector.shape_cast %200 : vector<8xf32> to vector<8x1xf32>
    %cst_72 = arith.constant 3.200000e+01 : f32
    %202 = vector.broadcast %cst_72 : f32 to vector<8x1xf32>
    %203 = arith.divf %201, %202 : vector<8x1xf32>
    %204 = vector.broadcast %196 : vector<8x1xf32> to vector<8x32xf32>
    %205 = arith.subf %192, %204 : vector<8x32xf32>
    %cst_73 = arith.constant 9.99999974E-6 : f32
    %206 = vector.broadcast %cst_73 : f32 to vector<8x1xf32>
    %207 = arith.addf %203, %206 : vector<8x1xf32>
    %208 = math.rsqrt %207 : vector<8x1xf32>
    %209 = vector.broadcast %208 : vector<8x1xf32> to vector<8x32xf32>
    %210 = arith.mulf %205, %209 : vector<8x32xf32>
    %211 = vector.broadcast %10 : vector<1x32xf32> to vector<8x32xf32>
    %212 = arith.mulf %210, %211 : vector<8x32xf32>
    %213 = vector.broadcast %11 : vector<1x32xf32> to vector<8x32xf32>
    %214 = arith.addf %212, %213 : vector<8x32xf32>
    %c0_74 = arith.constant 0 : index
    %c1_75 = arith.constant 1 : index
    %c0_76 = arith.constant 0 : index
    %215 = vector.load %arg9[%c0_74, %c1_75, %c0_76] : memref<8x2x32xf32, #tpu.memory_space<vmem>>, vector<8x1x32xf32>
    %216 = vector.shape_cast %215 : vector<8x1x32xf32> to vector<8x32xf32>
    %217 = vector.shape_cast %214 : vector<8x32xf32> to vector<8x1x32xf32>
    tpu.vector_store %arg9[%c0_74, %c1_75, %c0_76], %217 {strides = array<i32>} : memref<8x2x32xf32, #tpu.memory_space<vmem>>, vector<8x1x32xf32>,
    return
  }
  func.func @transform_0(%arg0: i32) -> (i32, i32, i32) {
    %c0_i32 = arith.constant 0 : i32
    %c0_i32_0 = arith.constant 0 : i32
    %c0_i32_1 = arith.constant 0 : i32
    %c0_i32_2 = arith.constant 0 : i32
    return %c0_i32, %c0_i32_0, %c0_i32_1 : i32, i32, i32
  }
  func.func @transform_1(%arg0: i32) -> (i32, i32) {
    %c0_i32 = arith.constant 0 : i32
    %c0_i32_0 = arith.constant 0 : i32
    %c0_i32_1 = arith.constant 0 : i32
    return %c0_i32, %c0_i32_0 : i32, i32
  }
  func.func @transform_2(%arg0: i32) -> (i32, i32) {
    %c0_i32 = arith.constant 0 : i32
    %c0_i32_0 = arith.constant 0 : i32
    %c0_i32_1 = arith.constant 0 : i32
    return %c0_i32, %c0_i32_0 : i32, i32
  }
  func.func @transform_3(%arg0: i32) -> (i32, i32) {
    %c0_i32 = arith.constant 0 : i32
    %c0_i32_0 = arith.constant 0 : i32
    %c0_i32_1 = arith.constant 0 : i32
    return %c0_i32, %c0_i32_0 : i32, i32
  }
  func.func @transform_4(%arg0: i32) -> (i32, i32) {
    %c0_i32 = arith.constant 0 : i32
    %c0_i32_0 = arith.constant 0 : i32
    %c0_i32_1 = arith.constant 0 : i32
    return %c0_i32, %c0_i32_0 : i32, i32
  }
  func.func @transform_5(%arg0: i32) -> (i32, i32) {
    %c0_i32 = arith.constant 0 : i32
    %c0_i32_0 = arith.constant 0 : i32
    %c0_i32_1 = arith.constant 0 : i32
    return %c0_i32, %c0_i32_0 : i32, i32
  }
  func.func @transform_6(%arg0: i32) -> (i32, i32) {
    %c0_i32 = arith.constant 0 : i32
    %c0_i32_0 = arith.constant 0 : i32
    %c0_i32_1 = arith.constant 0 : i32
    return %c0_i32, %c0_i32_0 : i32, i32
  }
  func.func @transform_7(%arg0: i32) -> (i32, i32) {
    %c0_i32 = arith.constant 0 : i32
    %c0_i32_0 = arith.constant 0 : i32
    %c0_i32_1 = arith.constant 0 : i32
    return %c0_i32, %c0_i32_0 : i32, i32
  }
  func.func @transform_8(%arg0: i32) -> (i32, i32, i32) {
    %c0_i32 = arith.constant 0 : i32
    %c0_i32_0 = arith.constant 0 : i32
    %c0_i32_1 = arith.constant 0 : i32
    %c0_i32_2 = arith.constant 0 : i32
    return %c0_i32, %c0_i32_0, %c0_i32_1 : i32, i32, i32
  }
}

</mosaic_0001>

<bundles_post_ra>
// kernel: tpu_custom_call.1
= control target key start
LH: loop header
LB: loop body
LE: loop exit
PB: predicated region body
PF: predicated region fallthrough
CT: control target
= control target key end

     0   :  { %13 = vsyncpa [#allocation3], 0  ;;  %s1321_s0 = inlined_call_operand.hbm [shape: f32[8,2,32], index: 0, kind: input, shape index: {}]   ;;  %s1322_s1 = inlined_call_operand.hbm [shape: f32[8,8], index: 1, kind: input, shape index: {}]   ;;  %s1323_s2 = inlined_call_operand.vmem [shape: f32[32,96], index: 2, kind: input, shape index: {}]   ;;  %s1324_s3 = inlined_call_operand.vmem [shape: f32[32,32], index: 3, kind: input, shape index: {}]   ;;  %s1325_s4 = inlined_call_operand.vmem [shape: f32[32,64], index: 4, kind: input, shape index: {}]   ;;  %s1326_s5 = inlined_call_operand.vmem [shape: f32[1,64], index: 5, kind: input, shape index: {}]   ;;  %s1327_s6 = inlined_call_operand.vmem [shape: f32[64,32], index: 6, kind: input, shape index: {}]   ;;  %s1328_s7 = inlined_call_operand.hbm [shape: f32[8,32], index: 7, kind: input, shape index: {}]   ;;  %s1329_s8 = inlined_call_operand.hbm [shape: f32[8,2,32], index: 8, kind: output, shape index: {}]  }
   0x1   :  { %14 = vsyncpa [#allocation6], 0  ;;  %s34_s29 = sshll.u32 %s1322_s1, 4  ;;  %s35_s29 = int_to_ptr.hbm [resolvable:$true] %s34_s29 }
   0x2   :  { %15 = vsyncpa [#allocation4], 0  ;;  %s1010_s30 = smov [#allocation5]   ;;  %s20_s12 = sshll.u32 %s1321_s0, 4  ;;  %s21_s12 = int_to_ptr.hbm [resolvable:$true] %s20_s12 }
   0x3   :  { %s36_s9 = sshll.u32 %s1010_s30, 4  ;;  %s1011_s13 = smov [#allocation2]   ;;  %s37_s9 = int_to_ptr.vmem [resolvable:$true] %s36_s9 }
   0x4   :  { %39 = dma.hbm_to_vmem [thread:$0]  %s35_s29, 128, %s37_s9, [#allocation6]  }
   0x5   :  { %s22_s14 = sshll.u32 %s1011_s13, 4  ;;  %s1012_s15 = smov 32   ;;  %s23_s14 = int_to_ptr.vmem [resolvable:$true] %s22_s14 }
   0x6   :  { %s1013_s16 = smov 2   ;;  %s55_s18 = sshll.u32 %s1328_s7, 4  ;;  %s56_s18 = int_to_ptr.hbm [resolvable:$true] %s55_s18 }
   0x7   :  { %28 = dma.hbm_to_vmem [thread:$0]  %s21_s12, 256, %s23_s14, [#allocation3], %s1012_s15, %s1012_s15, %s1013_s16  }
   0x8   :  { %s1014_s19 = smov [#allocation7]  }
   0x9   :  { %s57_s20 = sshll.u32 %s1014_s19, 4  ;;  %s58_s20 = int_to_ptr.vmem [resolvable:$true] %s57_s20 }
   0xa   :  { %60 = dma.hbm_to_vmem [thread:$0]  %s56_s18, 128, %s58_s20, [#allocation6]  }
   0xb   :  { %1004 = dma.done.wait [#allocation3], 256  }
   0xc   :  { %1005 = vsyncadd [#allocation3], 4294967040 }
   0xd   :  { %1006 = dma.done.wait [#allocation6], 256  }
   0xe   :  { %1007 = vsyncadd [#allocation6], 4294967040  ;;  %v1082_v0 = vld [vmem:[%s1323_s2 + $0x18] sm:$0xff]  ;;  %v1087_v1 = vld [vmem:[%s1323_s2 + $0x10] sm:$0xff]  ;;  %vm113_vm0 = vcmask 1041409   ;;  %vm116_vm1 = vcmask 1042434  }
   0xf   :  { %148 = vmatpush.msra.mxu0 %v1082_v0  ;;  %v1093_v2 = vld [vmem:[%s1323_s2 + $0x8] sm:$0xff]  ;;  %v97_v3 = vld [vmem:[#allocation2 + $0x2] sm:$0x1]  ;;  %v98_v4 = vld [vmem:[#allocation2 + $0x4] sm:$0x1]  ;;  %vm119_vm2 = vcmask 1043459  }
  0x10   :  { %v99_v5 = vld [vmem:[#allocation2 + $0x6] sm:$0x1]  ;;  %v100_v6 = vld [vmem:[#allocation2 + $0x8] sm:$0x1]  ;;  %v96_v7 = vld [vmem:[#allocation2] sm:$0x1] }
  0x11   :  { %149 = vmatpush.msra.mxu0 %v1087_v1  ;;  %v101_v8 = vld [vmem:[#allocation2 + $0xa] sm:$0x1]  ;;  %v102_v9 = vld [vmem:[#allocation2 + $0xc] sm:$0x1]  ;;  %v1099_v10 = vld [vmem:[%s1323_s2] sm:$0xff]  ;;  %v112_v11 = vrot.slane %v97_v3, 7 }
  0x12   :  { %v115_v12 = vrot.slane %v98_v4, 6  ;;  %v118_v13 = vrot.slane %v99_v5, 5  ;;  %v103_v14 = vld [vmem:[#allocation2 + $0xe] sm:$0x1]  ;;  %v121_v15 = vrot.slane %v100_v6, 4  ;;  %vm122_vm3 = vcmask 1044484  }
  0x13   :  { %150 = vmatpush.msra.mxu0 %v1093_v2  ;;  %v114_v16 = vsel %vm113_vm0, %v112_v11, %v96_v7  ;;  %v124_v17 = vrot.slane %v101_v8, 3  ;;  %vm125_vm4 = vcmask 1045509   ;;  %v127_v19 = vrot.slane %v102_v9, 2  ;;  %s1015_s2 = smov 112   ;;  %s1016_s27 = smov 96   ;;  %v1121_v31 = vld [vmem:[#allocation5] sm:$0xff] }
  0x14   :  { %v117_v18 = vsel %vm116_vm1, %v115_v12, %v114_v16  ;;  %vm128_vm5 = vcmask 1046534   ;;  %v130_v21 = vrot.slane %v103_v14, 1  ;;  %vm131_vm6 = vcmask 1047559   ;;  %s1017_s28 = smov 80   ;;  %s1018_s29 = smov 64   ;;  %v1134_v49 = vld [vmem:[%s1324_s3 + $0x8] sm:$0xff] }
  0x15   :  { %151 = vmatpush.msra.mxu0 %v1099_v10  ;;  %v120_v20 = vsel %vm119_vm2, %v118_v13, %v117_v18  ;;  %vm133_vm7 = vcmask 261120   ;;  %vm159_vm8 = vcmask 130048   ;;  %vm186_vm9 = vcmask 64512   ;;  %s1019_s30 = smov 48   ;;  %331 = vmatpush.msra.mxu3 %v1134_v49  ;;  %v1142_v58 = vld [vmem:[%s1324_s3] sm:$0xff]  ;;  %v1148_v59 = vld [vmem:[%s1324_s3 + $0x18] sm:$0xff] }
  0x16   :  { %v123_v22 = vsel %vm122_vm3, %v121_v15, %v120_v20  ;;  %v1154_v60 = vld [vmem:[%s1324_s3 + $0x10] sm:$0xff]  ;;  %v476_v61 = vld [vmem:[#allocation2 + $0x3] sm:$0x1]  ;;  %v477_v62 = vld [vmem:[#allocation2 + $0x5] sm:$0x1]  ;;  %vm400_vm14 = vcmask 523264  }
  0x17   :  { %v126_v23 = vsel %vm125_vm4, %v124_v17, %v123_v22  ;;  %332 = vmatpush.msra.mxu3 %v1142_v58  ;;  %v491_v63 = vrot.slane %v476_v61, 7  ;;  %v475_v3 = vld [vmem:[#allocation2 + $0x1] sm:$0x1]  ;;  %v478_v4 = vld [vmem:[#allocation2 + $0x7] sm:$0x1]  ;;  %v493_v5 = vrot.slane %v477_v62, 6 }
  0x18   :  { %v129_v24 = vsel %vm128_vm5, %v127_v19, %v126_v23  ;;  %v479_v7 = vld [vmem:[#allocation2 + $0x9] sm:$0x1]  ;;  %v495_v8 = vrot.slane %v478_v4, 5  ;;  %v482_v14 = vld [vmem:[#allocation2 + $0xf] sm:$0x1]  ;;  %v84_v61 = vld [vmem:[%s1325_s4 + $0x10] sm:$0xff] }
  0x19   :  { %v1110_v25 = vsel %vm131_vm6, %v130_v21, %v129_v24  ;;  %v492_v6 = vsel %vm113_vm0, %v491_v63, %v475_v3  ;;  %v503_v18 = vrot.slane %v482_v14, 1  ;;  %v83_v3 = vld [vmem:[%s1325_s4 + $0x8] sm:$0xff]  ;;  %v82_v4 = vld [vmem:[%s1325_s4] sm:$0xff]  ;;  %s833_s19 = sshll.u32 %s1329_s8, 4  ;;  %s834_s19 = int_to_ptr.hbm [resolvable:$true] %s833_s19 }
  0x1a   :  { %847 = vmatmul.msk.f32.vlgmr.msra.gmra.mxu0 %vm133_vm7, %v1110_v25  ;;  %v494_v9 = vsel %vm116_vm1, %v493_v5, %v492_v6 }
  0x97   :  { %v153_v26 = vpop.f32.mrf.mxu0 }
  0x98   :  { %224 = vrot.lane.b32.xlu1 %v153_v26, %s1015_s2  ;;  %157 = vrot.lane.b32.xlu0 %v153_v26, %s1016_s27 }
  0xa0   :  { %226 = vrot.lane.b32.xlu0 %v153_v26, %s1017_s28 }
 0x10a   :  { %v158_v27 = vpop.permute.xlu0 %157  ;;  %v225_v29 = vpop.permute.xlu1 %224 }
 0x10b   :  { %848 = vmatpush.xpose.msk.msra.mxu1 %vm159_vm8, %v158_v27 }
 0x10e   :  { %849 = vmatmul.msk.f32.vlgmr.msra.gmra.mxu1 %vm159_vm8, %v153_v26 }
 0x10f   :  { %308 = vmatpush.msrb.mxu1 %v1148_v59 }
 0x111   :  { %309 = vmatpush.msrb.mxu1 %v1154_v60 }
 0x112   :  { %v227_v28 = vpop.permute.xlu0 %226 }
 0x113   :  { %851 = vmatpush.xpose.msk.msrb.mxu0 %vm159_vm8, %v227_v28  ;;  %519 = vmatpush.msra.mxu1 %v1082_v0  ;;  %v480_v0 = vld [vmem:[#allocation2 + $0xb] sm:$0x1] }
 0x114   :  { %v499_v12 = vrot.slane %v480_v0, 3 }
 0x115   :  { %520 = vmatpush.msra.mxu1 %v1087_v1  ;;  %v497_v1 = vrot.slane %v479_v7, 4 }
 0x116   :  { %852 = vmatmul.msk.f32.vlgmr.msrb.gmra.mxu0 %vm159_vm8, %v225_v29 }
 0x117   :  { %521 = vmatpush.msra.mxu1 %v1093_v2  ;;  %v496_v2 = vsel %vm119_vm2, %v495_v8, %v494_v9 }
 0x118   :  { %v498_v13 = vsel %vm122_vm3, %v497_v1, %v496_v2 }
 0x119   :  { %522 = vmatpush.msra.mxu1 %v1099_v10  ;;  %v481_v10 = vld [vmem:[#allocation2 + $0xd] sm:$0x1]  ;;  %v500_v17 = vsel %vm125_vm4, %v499_v12, %v498_v13  ;;  %v1217_v12 = vld [vmem:[#allocation7] sm:$0xff] }
 0x11a   :  { %v501_v15 = vrot.slane %v481_v10, 2 }
 0x11c   :  { %v502_v19 = vsel %vm128_vm5, %v501_v15, %v500_v17  ;;  %v368_v15 = vperm.slane %v1217_v12, 1  ;;  %vm466_vm5 = vcmask 253952  }
 0x11d   :  { %v1170_v20 = vsel %vm131_vm6, %v503_v18, %v502_v19  ;;  %v370_v18 = vperm.slane %v1217_v12, 2 }
 0x18b   :  { %v181_v30 = vpop.f32.mrf.mxu1 }
 0x18c   :  { %v184_v32 = vmul.f32 0.25, %v181_v30  ;;  %v1020_v30 = vmov 32.0  }
 0x18e   :  { %v185_v33 = vadd.f32 %v184_v32, %v1121_v31 }
 0x190   :  { %v187_v34 = vsel %vm186_vm9, %v185_v33, -inf }
 0x191   :  { %188 = vmax.xlane.f32.xlu1 %v187_v34 }
 0x193   :  { %v249_v35 = vpop.f32.mrf.mxu0 }
 0x194   :  { %v252_v36 = vmul.f32 0.25, %v249_v35 }
 0x196   :  { %v253_v37 = vadd.f32 %v252_v36, %v1121_v31 }
 0x198   :  { %v254_v38 = vsel %vm186_vm9, %v253_v37, -inf }
 0x199   :  { %255 = vmax.xlane.f32.xlu2 %v254_v38 }
 0x204   :  { %v189_v39 = vpop.xlane.xlu1 %188 }
 0x205   :  { %v190_v40 = vsub.f32 %v185_v33, %v189_v39 }
 0x207   :  { %v191_v41 = vmul.f32 1.442695, %v190_v40 }
 0x209   :  { %882 = vpow2.f32 %v191_v41 }
 0x20c   :  { %v256_v42 = vpop.xlane.xlu2 %255 }
 0x20d   :  { %v257_v43 = vsub.f32 %v253_v37, %v256_v42 }
 0x20f   :  { %v883_v44 = vpop.eup %882  ;;  %v258_v45 = vmul.f32 1.442695, %v257_v43 }
 0x210   :  { %v193_v46 = vsel %vm186_vm9, %v883_v44, 0.0 }
 0x211   :  { %884 = vpow2.f32 %v258_v45  ;;  %194 = vadd.xlane.f32.xlu2 %v193_v46 }
 0x217   :  { %v885_v47 = vpop.eup %884 }
 0x218   :  { %v260_v48 = vsel %vm186_vm9, %v885_v47, 0.0 }
 0x219   :  { %261 = vadd.xlane.f32.xlu0 %v260_v48 }
 0x229   :  { %198 = vrot.lane.b32.xlu2 %v153_v26, %s1018_s29 }
 0x231   :  { %265 = vrot.lane.b32.xlu2 %v153_v26, %s1019_s30 }
 0x284   :  { %v195_v50 = vpop.xlane.xlu2 %194 }
 0x285   :  { %886 = vrcp.f32 %v195_v50 }
 0x28b   :  { %v887_v51 = vpop.eup %886 }
 0x28c   :  { %v262_v52 = vpop.xlane.xlu0 %261  ;;  %v199_v53 = vpop.permute.xlu2 %198  ;;  %v197_v54 = vmul.f32 %v887_v51, %v883_v44 }
 0x28d   :  { %888 = vrcp.f32 %v262_v52  ;;  %219 = vmatpush.msra.mxu2 %v199_v53 }
 0x28e   :  { %850 = vmatmul.msk.f32.vlgmr.msra.gmra.mxu2 %vm186_vm9, %v197_v54  ;;  %890 = vrcp.f32 %v1020_v30  ;;  %v87_v30 = vld [vmem:[%s1327_s6] sm:$0xff] }
 0x293   :  { %v889_v55 = vpop.eup %888 }
 0x294   :  { %v266_v56 = vpop.permute.xlu2 %265  ;;  %v264_v57 = vmul.f32 %v889_v55, %v885_v47  ;;  %v891_v32 = vpop.eup %890 }
 0x295   :  { %286 = vmatpush.msrb.mxu2 %v266_v56  ;;  %v343_v33 = vmul.f32 32.0, %v891_v32  ;;  %vm347_vm10 = vweird.f32 %v891_v32 }
 0x296   :  { %853 = vmatmul.msk.f32.vlgmr.msrb.gmra.mxu2 %vm186_vm9, %v264_v57  ;;  %v85_v57 = vld [vmem:[%s1325_s4 + $0x18] sm:$0xff] }
 0x297   :  { %v344_v37 = vsub.f32 1.0, %v343_v33  ;;  %390 = vmatpush.msra.mxu0 %v85_v57 }
 0x299   :  { %v345_v39 = vmul.f32 %v891_v32, %v344_v37  ;;  %391 = vmatpush.msra.mxu0 %v84_v61 }
 0x29b   :  { %v346_v40 = vadd.f32 %v891_v32, %v345_v39  ;;  %392 = vmatpush.msra.mxu0 %v83_v3 }
 0x29d   :  { %v1191_v41 = vsel %vm347_vm10, %v891_v32, %v346_v40  ;;  %393 = vmatpush.msra.mxu0 %v82_v4 }
 0x311   :  { %v221_v11 = vpop.f32.mrf.mxu2 }
 0x312   :  { %855 = vmatmul.msk.f32.vlgmr.msra.gmra.mxu3 %vm159_vm8, %v221_v11 }
 0x319   :  { %v288_v16 = vpop.f32.mrf.mxu2 }
 0x31a   :  { %854 = vmatmul.msk.f32.vlgmr.msrb.gmra.mxu1 %vm159_vm8, %v288_v16 }
 0x322   :  { %858 = vmatmul.msk.f32.vlgmr.msra.gmra.mxu1 %vm133_vm7, %v1170_v20 }
 0x395   :  { %v334_v21 = vpop.f32.mrf.mxu3 }
 0x397   :  { %v311_v22 = vpop.f32.mrf.mxu1 }
 0x398   :  { %v335_v23 = vadd.f32 %v334_v21, %v311_v22  ;;  %v94_v22 = vld [vmem:[%s1327_s6 + $0x38] sm:$0xff] }
 0x399   :  { %412 = vmatpush.msra.mxu2 %v94_v22 }
 0x39a   :  { %v338_v24 = vadd.f32 %v335_v23, %v1110_v25  ;;  %v93_v23 = vld [vmem:[%s1327_s6 + $0x30] sm:$0xff] }
 0x39b   :  { %413 = vmatpush.msra.mxu2 %v93_v23 }
 0x39c   :  { %v339_v26 = vsel %vm133_vm7, %v338_v24, 0.0 }
 0x39d   :  { %340 = vadd.xlane.f32.xlu0 %v339_v26  ;;  %v91_v26 = vld [vmem:[%s1327_s6 + $0x20] sm:$0xff] }
 0x39f   :  { %v1176_v27 = vpop.f32.mrf.mxu1 }
 0x3a0   :  { %595 = vrot.lane.b32.xlu1 %v1176_v27, %s1017_s28  ;;  %528 = vrot.lane.b32.xlu2 %v1176_v27, %s1016_s27 }
 0x3a8   :  { %593 = vrot.lane.b32.xlu2 %v1176_v27, %s1015_s2 }
 0x3fa   :  { %v529_v28 = vpop.permute.xlu2 %528 }
 0x3fb   :  { %859 = vmatpush.xpose.msk.msrb.mxu3 %vm159_vm8, %v529_v28 }
 0x3fe   :  { %860 = vmatmul.msk.f32.vlgmr.msrb.gmra.mxu3 %vm159_vm8, %v1176_v27 }
 0x402   :  { %v594_v29 = vpop.permute.xlu2 %593 }
 0x410   :  { %v341_v42 = vpop.xlane.xlu0 %340 }
 0x411   :  { %v349_v44 = vmul.f32 %v1191_v41, %v341_v42 }
 0x412   :  { %v596_v25 = vpop.permute.xlu1 %595 }
 0x413   :  { %862 = vmatpush.xpose.msk.msrb.mxu1 %vm159_vm8, %v596_v25  ;;  %v350_v47 = vsub.f32 %v338_v24, %v349_v44  ;;  %v92_v24 = vld [vmem:[%s1327_s6 + $0x28] sm:$0xff]  ;;  %v89_v25 = vld [vmem:[%s1327_s6 + $0x10] sm:$0xff] }
 0x414   :  { %414 = vmatpush.msra.mxu2 %v92_v24 }
 0x415   :  { %v351_v50 = vmul.f32 %v350_v47, %v350_v47 }
 0x416   :  { %863 = vmatmul.msk.f32.vlgmr.msrb.gmra.mxu1 %vm159_vm8, %v594_v29  ;;  %415 = vmatpush.msra.mxu2 %v91_v26  ;;  %v88_v29 = vld [vmem:[%s1327_s6 + $0x8] sm:$0xff] }
 0x417   :  { %v352_v51 = vsel %vm133_vm7, %v351_v50, 0.0  ;;  %747 = vmatpush.msra.mxu1 %v85_v57  ;;  %v399_v50 = vperm.slane %v1217_v12, 0 }
 0x419   :  { %748 = vmatpush.msra.mxu1 %v84_v61 }
 0x41b   :  { %749 = vmatpush.msra.mxu1 %v83_v3 }
 0x41d   :  { %750 = vmatpush.msra.mxu1 %v82_v4 }
 0x481   :  { %v551_v34 = vpop.f32.mrf.mxu3 }
 0x482   :  { %v554_v35 = vmul.f32 0.25, %v551_v34 }
 0x484   :  { %v555_v36 = vadd.f32 %v554_v35, %v1121_v31 }
 0x486   :  { %v556_v38 = vsel %vm186_vm9, %v555_v36, -inf }
 0x487   :  { %557 = vmax.xlane.f32.xlu2 %v556_v38 }
 0x493   :  { %v618_v43 = vpop.f32.mrf.mxu1 }
 0x494   :  { %v621_v45 = vmul.f32 0.25, %v618_v43 }
 0x496   :  { %v622_v46 = vadd.f32 %v621_v45, %v1121_v31 }
 0x498   :  { %v623_v48 = vsel %vm186_vm9, %v622_v46, -inf }
 0x499   :  { %624 = vmax.xlane.f32.xlu0 %v623_v48 }
 0x49f   :  { %634 = vrot.lane.b32.xlu2 %v1176_v27, %s1019_s30 }
 0x4a1   :  { %353 = vadd.xlane.f32.xlu0 %v352_v51 }
 0x4fa   :  { %v558_v52 = vpop.xlane.xlu2 %557 }
 0x4fb   :  { %v559_v53 = vsub.f32 %v555_v36, %v558_v52 }
 0x4fd   :  { %v560_v54 = vmul.f32 1.442695, %v559_v53 }
 0x4ff   :  { %892 = vpow2.f32 %v560_v54 }
 0x502   :  { %v635_v55 = vpop.permute.xlu2 %634 }
 0x503   :  { %655 = vmatpush.msra.mxu3 %v635_v55 }
 0x505   :  { %v1199_v56 = vpop.eup %892  ;;  %767 = vmatpush.msrb.mxu3 %v94_v22 }
 0x506   :  { %v562_v31 = vsel %vm186_vm9, %v1199_v56, 0.0 }
 0x507   :  { %563 = vadd.xlane.f32.xlu1 %v562_v31  ;;  %768 = vmatpush.msrb.mxu3 %v93_v23 }
 0x509   :  { %769 = vmatpush.msrb.mxu3 %v92_v24 }
 0x50b   :  { %770 = vmatpush.msrb.mxu3 %v91_v26 }
 0x50c   :  { %v625_v62 = vpop.xlane.xlu0 %624 }
 0x50d   :  { %v626_v63 = vsub.f32 %v622_v46, %v625_v62 }
 0x50f   :  { %v627_v5 = vmul.f32 1.442695, %v626_v63 }
 0x511   :  { %894 = vpow2.f32 %v627_v5 }
 0x514   :  { %v354_v6 = vpop.xlane.xlu0 %353 }
 0x515   :  { %v355_v7 = vmul.f32 %v354_v6, %v1191_v41 }
 0x517   :  { %v895_v8 = vpop.eup %894  ;;  %v356_v9 = vadd.f32 1e-05, %v355_v7 }
 0x518   :  { %v629_v11 = vsel %vm186_vm9, %v895_v8, 0.0 }
 0x519   :  { %896 = vrsqrt.f32 %v356_v9  ;;  %630 = vadd.xlane.f32.xlu0 %v629_v11  ;;  %vm363_vm12 = vweird.f32 %v356_v9 }
 0x51f   :  { %v897_v0 = vpop.eup %896 }
 0x520   :  { %v358_v1 = vmul.f32 %v897_v0, %v356_v9  ;;  %vm364_vm11 = vweird.f32 %v897_v0 }
 0x521   :  { %vm365_vm13 = vmor %vm363_vm12, %vm364_vm11 }
 0x522   :  { %v359_v2 = vmul.f32 %v897_v0, %v358_v1 }
 0x524   :  { %v360_v10 = vmul.f32 0.5, %v359_v2 }
 0x526   :  { %v361_v13 = vsub.f32 1.5, %v360_v10 }
 0x528   :  { %v362_v14 = vmul.f32 %v897_v0, %v361_v13 }
 0x52a   :  { %v366_v16 = vsel %vm365_vm13, %v897_v0, %v362_v14 }
 0x52b   :  { %v367_v17 = vmul.f32 %v366_v16, %v350_v47 }
 0x52d   :  { %v369_v19 = vmul.f32 %v368_v15, %v367_v17  ;;  %567 = vrot.lane.b32.xlu0 %v1176_v27, %s1018_s29  ;;  %v90_v27 = vld [vmem:[%s1327_s6 + $0x18] sm:$0xff] }
 0x52e   :  { %416 = vmatpush.msra.mxu2 %v90_v27  ;;  %771 = vmatpush.msrb.mxu3 %v90_v27 }
 0x52f   :  { %v1227_v21 = vadd.f32 %v370_v18, %v369_v19 }
 0x530   :  { %417 = vmatpush.msra.mxu2 %v89_v25  ;;  %772 = vmatpush.msrb.mxu3 %v89_v25 }
 0x531   :  { %856 = vmatmul.msk.f32.vlgmr.msra.gmra.mxu0 %vm133_vm7, %v1227_v21 }
 0x532   :  { %418 = vmatpush.msra.mxu2 %v88_v29  ;;  %773 = vmatpush.msrb.mxu3 %v88_v29 }
 0x534   :  { %419 = vmatpush.msra.mxu2 %v87_v30  ;;  %774 = vmatpush.msrb.mxu3 %v87_v30 }
 0x536   :  { %700 = vmatpush.msrb.mxu2 %v1134_v49  ;;  %v1265_v49 = vld [vmem:[%s1326_s5] ss:$0 sm:$0xff]  ;;  %s1021_s5 = smov [#allocation8]  }
 0x537   :  { %s831_s17 = sshll.u32 %s1021_s5, 4  ;;  %s832_s17 = int_to_ptr.vmem [resolvable:$true] %s831_s17 }
 0x538   :  { %701 = vmatpush.msrb.mxu2 %v1142_v58 }
 0x57a   :  { %v564_v33 = vpop.xlane.xlu1 %563 }
 0x58c   :  { %v631_v28 = vpop.xlane.xlu0 %630 }
 0x58d   :  { %898 = vrcp.f32 %v631_v28 }
 0x58e   :  { %900 = vrcp.f32 %v564_v33 }
 0x593   :  { %v899_v32 = vpop.eup %898 }
 0x594   :  { %v633_v34 = vmul.f32 %v899_v32, %v895_v8  ;;  %v901_v35 = vpop.eup %900 }
 0x595   :  { %v566_v36 = vmul.f32 %v901_v35, %v1199_v56 }
 0x596   :  { %864 = vmatmul.msk.f32.vlgmr.msra.gmra.mxu3 %vm186_vm9, %v633_v34 }
 0x59f   :  { %v568_v37 = vpop.permute.xlu0 %567 }
 0x5a0   :  { %588 = vmatpush.msrb.mxu0 %v568_v37 }
 0x5a1   :  { %861 = vmatmul.msk.f32.vlgmr.msrb.gmra.mxu0 %vm186_vm9, %v566_v36 }
 0x5a2   :  { %677 = vmatpush.msra.mxu0 %v1148_v59 }
 0x5a4   :  { %678 = vmatpush.msra.mxu0 %v1154_v60 }
 0x5ae   :  { %v395_v58 = vpop.f32.mrf.mxu0 }
 0x5af   :  { %v396_v38 = vadd.f32 %v1265_v49, %v395_v58 }
 0x5b1   :  { %v398_v39 = vmax.f32 %v396_v38, 0.0 }
 0x5b3   :  { %857 = vmatmul.msk.f32.vlgmr.msra.gmra.mxu2 %vm400_vm14, %v398_v39 }
 0x619   :  { %v657_v40 = vpop.f32.mrf.mxu3 }
 0x61a   :  { %865 = vmatmul.msk.f32.vlgmr.msra.gmra.mxu0 %vm159_vm8, %v657_v40 }
 0x61e   :  { %v590_v42 = vpop.f32.mrf.mxu0 }
 0x61f   :  { %866 = vmatmul.msk.f32.vlgmr.msrb.gmra.mxu2 %vm159_vm8, %v590_v42 }
 0x636   :  { %v421_v59 = vpop.f32.mrf.mxu2 }
 0x637   :  { %v422_v53 = vadd.f32 %v421_v59, %v399_v50 }
 0x639   :  { %v424_v55 = vadd.f32 %v422_v53, %v1227_v21 }
 0x697   :  { %v680_v60 = vpop.f32.mrf.mxu0 }
 0x6a2   :  { %v703_v43 = vpop.f32.mrf.mxu2 }
 0x6a3   :  { %v704_v44 = vadd.f32 %v703_v43, %v680_v60 }
 0x6a5   :  { %v707_v45 = vadd.f32 %v704_v44, %v1170_v20  ;;  %v425_v20 = vsel %vm133_vm7, %v424_v55, 0.0 }
 0x6a7   :  { %v708_v46 = vsel %vm133_vm7, %v707_v45, 0.0 }
 0x6a8   :  { %709 = vadd.xlane.f32.xlu0 %v708_v46 }
 0x71b   :  { %v710_v47 = vpop.xlane.xlu0 %709 }
 0x71c   :  { %v711_v48 = vmul.f32 %v710_v47, %v1191_v41 }
 0x71e   :  { %v712_v51 = vsub.f32 %v707_v45, %v711_v48 }
 0x720   :  { %v713_v52 = vmul.f32 %v712_v51, %v712_v51 }
 0x722   :  { %v714_v54 = vsel %vm133_vm7, %v713_v52, 0.0 }
 0x723   :  { %715 = vadd.xlane.f32.xlu1 %v714_v54 }
 0x72b   :  { %426 = vadd.xlane.f32.xlu1 %v425_v20 }
 0x796   :  { %v716_v56 = vpop.xlane.xlu1 %715 }
 0x797   :  { %v717_v31 = vmul.f32 %v716_v56, %v1191_v41 }
 0x799   :  { %v718_v57 = vadd.f32 1e-05, %v717_v31 }
 0x79b   :  { %902 = vrsqrt.f32 %v718_v57  ;;  %vm725_vm0 = vweird.f32 %v718_v57 }
 0x79e   :  { %v427_v61 = vpop.xlane.xlu1 %426 }
 0x79f   :  { %v428_v62 = vmul.f32 %v427_v61, %v1191_v41 }
 0x7a1   :  { %v903_v63 = vpop.eup %902  ;;  %v429_v3 = vsub.f32 %v424_v55, %v428_v62 }
 0x7a2   :  { %v720_v4 = vmul.f32 %v903_v63, %v718_v57  ;;  %vm726_vm15 = vweird.f32 %v903_v63 }
 0x7a3   :  { %v430_v5 = vmul.f32 %v429_v3, %v429_v3  ;;  %vm727_vm1 = vmor %vm725_vm0, %vm726_vm15 }
 0x7a4   :  { %v721_v6 = vmul.f32 %v903_v63, %v720_v4 }
 0x7a5   :  { %v431_v7 = vsel %vm133_vm7, %v430_v5, 0.0 }
 0x7a6   :  { %v722_v8 = vmul.f32 0.5, %v721_v6  ;;  %432 = vadd.xlane.f32.xlu1 %v431_v7 }
 0x7a8   :  { %v723_v9 = vsub.f32 1.5, %v722_v8 }
 0x7aa   :  { %v724_v11 = vmul.f32 %v903_v63, %v723_v9 }
 0x7ac   :  { %v728_v0 = vsel %vm727_vm1, %v903_v63, %v724_v11 }
 0x7ad   :  { %v729_v1 = vmul.f32 %v728_v0, %v712_v51 }
 0x7af   :  { %v730_v2 = vmul.f32 %v729_v1, %v368_v15  ;;  %v447_v15 = vperm.slane %v1217_v12, 3 }
 0x7b1   :  { %v731_v10 = vadd.f32 %v730_v2, %v370_v18  ;;  %v449_v18 = vperm.slane %v1217_v12, 4 }
 0x7b3   :  { %867 = vmatmul.msk.f32.vlgmr.msra.gmra.mxu1 %vm133_vm7, %v731_v10 }
 0x819   :  { %v433_v13 = vpop.xlane.xlu1 %432 }
 0x81a   :  { %v434_v14 = vmul.f32 %v433_v13, %v1191_v41 }
 0x81c   :  { %v435_v16 = vadd.f32 1e-05, %v434_v14 }
 0x81e   :  { %904 = vrsqrt.f32 %v435_v16  ;;  %vm442_vm3 = vweird.f32 %v435_v16 }
 0x824   :  { %v905_v17 = vpop.eup %904 }
 0x825   :  { %v437_v19 = vmul.f32 %v905_v17, %v435_v16  ;;  %vm443_vm2 = vweird.f32 %v905_v17 }
 0x826   :  { %vm444_vm4 = vmor %vm442_vm3, %vm443_vm2 }
 0x827   :  { %v438_v21 = vmul.f32 %v905_v17, %v437_v19 }
 0x829   :  { %v439_v22 = vmul.f32 0.5, %v438_v21 }
 0x82b   :  { %v440_v23 = vsub.f32 1.5, %v439_v22 }
 0x82d   :  { %v441_v24 = vmul.f32 %v905_v17, %v440_v23 }
 0x82f   :  { %v445_v26 = vsel %vm444_vm4, %v905_v17, %v441_v24 }
 0x830   :  { %v446_v27 = vmul.f32 %v445_v26, %v429_v3  ;;  %v752_v28 = vpop.f32.mrf.mxu1 }
 0x831   :  { %v753_v25 = vadd.f32 %v1265_v49, %v752_v28 }
 0x832   :  { %v448_v29 = vmul.f32 %v447_v15, %v446_v27 }
 0x833   :  { %v755_v30 = vmax.f32 %v753_v25, 0.0 }
 0x834   :  { %v450_v32 = vadd.f32 %v449_v18, %v448_v29 }
 0x835   :  { %868 = vmatmul.msk.f32.vlgmr.msrb.gmra.mxu3 %vm400_vm14, %v755_v30 }
 0x836   :  { %v452_v33 = vrot.slane %v450_v32, 1  ;;  %v453_v34 = vrot.slane %v450_v32, 2  ;;  %v454_v35 = vrot.slane %v450_v32, 3  ;;  %467 = vst.msk [vmem:[#allocation8] sm:$0x1] %vm466_vm5, %v450_v32  ;;  %v455_v36 = vrot.slane %v450_v32, 4 }
 0x837   :  { %v456_v37 = vrot.slane %v450_v32, 5  ;;  %v457_v58 = vrot.slane %v450_v32, 6  ;;  %v458_v38 = vrot.slane %v450_v32, 7 }
 0x838   :  { %468 = vst.msk [vmem:[#allocation8 + $0x2] sm:$0x1] %vm466_vm5, %v452_v33 }
 0x839   :  { %469 = vst.msk [vmem:[#allocation8 + $0x4] sm:$0x1] %vm466_vm5, %v453_v34 }
 0x83a   :  { %470 = vst.msk [vmem:[#allocation8 + $0x6] sm:$0x1] %vm466_vm5, %v454_v35 }
 0x83b   :  { %471 = vst.msk [vmem:[#allocation8 + $0x8] sm:$0x1] %vm466_vm5, %v455_v36 }
 0x83c   :  { %472 = vst.msk [vmem:[#allocation8 + $0xa] sm:$0x1] %vm466_vm5, %v456_v37 }
 0x83d   :  { %473 = vst.msk [vmem:[#allocation8 + $0xc] sm:$0x1] %vm466_vm5, %v457_v58 }
 0x83e   :  { %474 = vst.msk [vmem:[#allocation8 + $0xe] sm:$0x1] %vm466_vm5, %v458_v38 }
 0x8b8   :  { %v776_v49 = vpop.f32.mrf.mxu3 }
 0x8b9   :  { %v777_v39 = vadd.f32 %v776_v49, %v399_v50 }
 0x8bb   :  { %v779_v40 = vadd.f32 %v777_v39, %v731_v10 }
 0x8bd   :  { %v780_v42 = vsel %vm133_vm7, %v779_v40, 0.0 }
 0x8be   :  { %781 = vadd.xlane.f32.xlu2 %v780_v42 }
 0x931   :  { %v782_v59 = vpop.xlane.xlu2 %781 }
 0x932   :  { %v783_v60 = vmul.f32 %v782_v59, %v1191_v41 }
 0x934   :  { %v784_v43 = vsub.f32 %v779_v40, %v783_v60 }
 0x936   :  { %v785_v44 = vmul.f32 %v784_v43, %v784_v43 }
 0x938   :  { %v786_v45 = vsel %vm133_vm7, %v785_v44, 0.0 }
 0x939   :  { %787 = vadd.xlane.f32.xlu1 %v786_v45 }
 0x9ac   :  { %v788_v46 = vpop.xlane.xlu1 %787 }
 0x9ad   :  { %v789_v47 = vmul.f32 %v788_v46, %v1191_v41 }
 0x9af   :  { %v790_v48 = vadd.f32 1e-05, %v789_v47 }
 0x9b1   :  { %906 = vrsqrt.f32 %v790_v48  ;;  %vm797_vm8 = vweird.f32 %v790_v48 }
 0x9b7   :  { %v907_v51 = vpop.eup %906 }
 0x9b8   :  { %v792_v12 = vmul.f32 %v907_v51, %v790_v48  ;;  %vm798_vm6 = vweird.f32 %v907_v51 }
 0x9b9   :  { %vm799_vm9 = vmor %vm797_vm8, %vm798_vm6 }
 0x9ba   :  { %v793_v50 = vmul.f32 %v907_v51, %v792_v12 }
 0x9bc   :  { %v794_v52 = vmul.f32 0.5, %v793_v50 }
 0x9be   :  { %v795_v53 = vsub.f32 1.5, %v794_v52 }
 0x9c0   :  { %v796_v54 = vmul.f32 %v907_v51, %v795_v53 }
 0x9c2   :  { %v800_v55 = vsel %vm799_vm9, %v907_v51, %v796_v54 }
 0x9c3   :  { %v801_v20 = vmul.f32 %v800_v55, %v784_v43 }
 0x9c5   :  { %v802_v56 = vmul.f32 %v801_v20, %v447_v15 }
 0x9c7   :  { %v803_v31 = vadd.f32 %v802_v56, %v449_v18 }
 0x9c9   :  { %v805_v57 = vrot.slane %v803_v31, 1  ;;  %v806_v61 = vrot.slane %v803_v31, 2  ;;  %v807_v62 = vrot.slane %v803_v31, 3  ;;  %819 = vst.msk [vmem:[#allocation8 + $0x1] sm:$0x1] %vm466_vm5, %v803_v31  ;;  %v808_v41 = vrot.slane %v803_v31, 4 }
 0x9ca   :  { %v809_v63 = vrot.slane %v803_v31, 5  ;;  %v810_v3 = vrot.slane %v803_v31, 6  ;;  %v811_v4 = vrot.slane %v803_v31, 7 }
 0x9cb   :  { %820 = vst.msk [vmem:[#allocation8 + $0x3] sm:$0x1] %vm466_vm5, %v805_v57 }
 0x9cc   :  { %821 = vst.msk [vmem:[#allocation8 + $0x5] sm:$0x1] %vm466_vm5, %v806_v61 }
 0x9cd   :  { %822 = vst.msk [vmem:[#allocation8 + $0x7] sm:$0x1] %vm466_vm5, %v807_v62 }
 0x9ce   :  { %823 = vst.msk [vmem:[#allocation8 + $0x9] sm:$0x1] %vm466_vm5, %v808_v41 }
 0x9cf   :  { %824 = vst.msk [vmem:[#allocation8 + $0xb] sm:$0x1] %vm466_vm5, %v809_v63 }
 0x9d0   :  { %825 = vst.msk [vmem:[#allocation8 + $0xd] sm:$0x1] %vm466_vm5, %v810_v3 }
 0x9d1   :  { %826 = vst.msk [vmem:[#allocation8 + $0xf] sm:$0x1] %vm466_vm5, %v811_v4 }
 0x9d2   :  { %839 = dma.vmem_to_hbm [thread:$0]  %s832_s17, 256, %s834_s19, [#allocation4], %s1012_s15, %s1012_s15, %s1013_s16  }
 0x9d3   :  { %1008 = dma.done.wait [#allocation4], 256  }
 0x9d4   :  { %1009 = vsyncadd [#allocation4], 4294967040 }
 0x9d5   :  { %844 = vsyncpa [#allocation3], 1 }
 0x9d6   :  { %845 = vsyncpa [#allocation6], 1 }
 0x9d7   :  { %846 = vsyncpa [#allocation4], 1 }

</bundles_post_ra>
